<compile_context>
chip_gen: v7x
topology: tpu7x:2x2x1
jax: 0.10.0
libtpu: 0.0.40
codegen_flags: <defaults>
</compile_context>

<pallas_src>
import functools

import jax
import jax.numpy as jnp
from jax.experimental import pallas as pl
from jax.experimental.pallas import tpu as pltpu


def _clamp_kernel(x_ref, o_ref, *, value_min, value_max):
    x = x_ref[...]
    if value_min is not None:
        x = jnp.maximum(x, jnp.asarray(value_min, dtype=x.dtype))
    if value_max is not None:
        x = jnp.minimum(x, jnp.asarray(value_max, dtype=x.dtype))
    o_ref[...] = x


def _device_tuning():
    """Per-generation block-size / VMEM-budget heuristics."""
    try:
        kind = jax.devices()[0].device_kind.lower()
    except Exception:
        kind = ""
    if ("v5" in kind) or ("v6" in kind):
        # 128 MiB physical VMEM, single TensorCore: large blocks amortize the
        # ~0.35us per-grid-step overhead down to a few percent.
        return dict(block_bytes=8 * 1024 * 1024,
                    vmem_limit=48 * 1024 * 1024,
                    num_cores=1)
    # v7x (and unknown chips): 64 MiB VMEM per TC, 2 TCs per chip -> cap at
    # 4 MiB per block buffer and keep the scoped-VMEM limit at 32 MiB.
    return dict(block_bytes=4 * 1024 * 1024,
                vmem_limit=32 * 1024 * 1024,
                num_cores=2)


def _choose_tile_rows(rows, lanes, itemsize, block_bytes, num_cores):
    """Row-tile that (a) fits the per-buffer VMEM budget, (b) splits the grid
    evenly over TensorCores on 2-TC chips, (c) respects sub-32-bit sublane
    packing (8 rows f32 / 16 bf16 / 32 int8)."""
    sub = max(8, 32 // itemsize)                      # packed-sublane rows
    bytes_per_row = lanes * itemsize
    max_tile = max(sub, (block_bytes // bytes_per_row) // sub * sub)
    if rows <= max_tile:
        # Whole slab fits in one block.  On 2-TC chips split it in two so both
        # cores stream HBM (otherwise ~half the chip bandwidth sits idle).
        if num_cores > 1 and rows >= 2 * sub:
            half = ((rows + 2 * sub - 1) // (2 * sub)) * sub
            return min(half, max_tile)
        return rows                                   # full-dim block is legal
    n_blocks = pl.cdiv(rows, max_tile)
    if num_cores > 1 and n_blocks % num_cores:
        n_blocks += num_cores - (n_blocks % num_cores)
    tile = ((pl.cdiv(rows, n_blocks) + sub - 1) // sub) * sub
    return min(tile, max_tile)


def _clamp_2d(x2d, value_min, value_max):
    rows, lanes = x2d.shape
    itemsize = x2d.dtype.itemsize
    tune = _device_tuning()
    tile_r = _choose_tile_rows(rows, lanes, itemsize,
                               tune["block_bytes"], tune["num_cores"])
    grid_r = pl.cdiv(rows, tile_r)                    # edge block padded by Pallas
    n_elems = rows * lanes

    kernel = functools.partial(
        _clamp_kernel, value_min=value_min, value_max=value_max)

    return pl.pallas_call(
        kernel,
        out_shape=jax.ShapeDtypeStruct((rows, lanes), x2d.dtype),
        grid_spec=pltpu.PrefetchScalarGridSpec(
            num_scalar_prefetch=0,
            grid=(grid_r,),
            in_specs=[pl.BlockSpec((tile_r, lanes), lambda i: (i, 0))],
            out_specs=pl.BlockSpec((tile_r, lanes), lambda i: (i, 0)),
        ),
        compiler_params=pltpu.CompilerParams(
            dimension_semantics=("parallel",),
            vmem_limit_bytes=tune["vmem_limit"],
        ),
        cost_estimate=pl.CostEstimate(
            flops=2 * n_elems,
            transcendentals=0,
            bytes_accessed=2 * n_elems * itemsize,
        ),
    )(x2d)


def clamp_pallas(x, value_min=None, value_max=None):
    """Elementwise clamp matching torch.clamp(x, min=value_min, max=value_max)."""
    if value_min is None and value_max is None:
        raise ValueError(
            "At least one of `value_min` or `value_max` must not be `None`.")
    # TODO(synk): for integer dtypes a fractional float bound is truncated by
    # the in-kernel cast (minor divergence from torch.clamp on int tensors).

    orig_shape = x.shape
    total = x.size
    flat = x.reshape(-1)

    # Fast path (no pad / no slice => no extra HBM passes): any total that is a
    # multiple of 128 reshapes for free into a lane-dense 2-D slab; the lane
    # count only changes the block's nominal shape (same contiguous layout),
    # so pick the largest divisor up to 1024.
    lanes = None
    for cand in (1024, 512, 256, 128):
        if total % cand == 0:
            lanes = cand
            break
    if lanes is not None:
        out2d = _clamp_2d(flat.reshape(total // lanes, lanes),
                          value_min, value_max)
        return out2d.reshape(orig_shape)

    # Ragged fallback (rare for NN activations): pad to a multiple of 1024,
    # clamp the padded garbage, slice it back off.
    # TODO(synk): pad + slice cost two extra full HBM passes; a masked-tail
    # 1-D/manual-DMA kernel path would remove them.
    lanes = 1024
    padded_total = pl.cdiv(total, lanes) * lanes
    flat = jnp.pad(flat, (0, padded_total - total))
    out2d = _clamp_2d(flat.reshape(padded_total // lanes, lanes),
                      value_min, value_max)
    return out2d.reshape(-1)[:total].reshape(orig_shape)


if __name__ == "__main__":
    key = jax.random.PRNGKey(0)
    # Small NCHW activation map (fast aligned path: 2048 elements).
    x = jax.random.normal(key, (2, 4, 16, 16), dtype=jnp.float32) * 2.0
    value_min, value_max = -0.5, 0.5

    out = jax.block_until_ready(clamp_pallas(x, value_min, value_max))
    ref = jnp.clip(x, value_min, value_max)
    assert out.shape == x.shape and out.dtype == x.dtype
    assert jnp.allclose(out, ref), "mismatch vs reference clamp"

    # One-sided clamps (the module allows either bound to be None).
    out_min = jax.block_until_ready(clamp_pallas(x, value_min=value_min))
    out_max = jax.block_until_ready(clamp_pallas(x, value_max=value_max))
    assert jnp.allclose(out_min, jnp.maximum(x, value_min))
    assert jnp.allclose(out_max, jnp.minimum(x, value_max))

    # bf16 input exercises the dtype-aware (packed-sublane) tile sizing.
    xb16 = x.astype(jnp.bfloat16)
    outb16 = jax.block_until_ready(clamp_pallas(xb16, value_min, value_max))
    assert outb16.dtype == jnp.bfloat16
    assert jnp.allclose(outb16.astype(jnp.float32),
                        jnp.clip(xb16, value_min, value_max).astype(jnp.float32))

    # Non-128-aligned shape exercises the ragged fallback path.
    key2 = jax.random.PRNGKey(1)
    xr = jax.random.normal(key2, (3, 5, 33, 47), dtype=jnp.float32) * 3.0
    outr = jax.block_until_ready(clamp_pallas(xr, value_min, value_max))
    assert jnp.allclose(outr, jnp.clip(xr, value_min, value_max))

    # Aligned mid-size shape: multi-block / even 2-core split on v7x,
    # single big block on v5e/v6e.
    key3 = jax.random.PRNGKey(2)
    xm = jax.random.normal(key3, (8, 32, 32, 32), dtype=jnp.float32)
    outm = jax.block_until_ready(clamp_pallas(xm, value_min, value_max))
    assert jnp.allclose(outm, jnp.clip(xm, value_min, value_max))

    print("KERNEL_OK")
</pallas_src>

<mosaic_0001>
module attributes {stable_mosaic.version = 11 : i64} {
  func.func @_clamp_kernel(%arg0: i32, %arg1: memref<2x1024xf32, #tpu.memory_space<vmem>>, %arg2: memref<2x1024xf32, #tpu.memory_space<vmem>>) attributes {dimension_semantics = [#tpu.dimension_semantics<parallel>], iteration_bounds = array<i64: 1>, scalar_prefetch = 0 : i64, scratch_operands = 0 : i64, tpu.core_type = #tpu.core_type<tc>, window_params = [{transform_indices = @transform_0, window_bounds = array<i64: 2, 1024>}, {transform_indices = @transform_1, window_bounds = array<i64: 2, 1024>}]} {
    %c0 = arith.constant 0 : index
    %c0_0 = arith.constant 0 : index
    %0 = vector.load %arg1[%c0, %c0_0] : memref<2x1024xf32, #tpu.memory_space<vmem>>, vector<2x1024xf32>
    %cst = arith.constant -5.000000e-01 : f32
    %1 = vector.broadcast %cst : f32 to vector<2x1024xf32>
    %2 = arith.maximumf %0, %1 : vector<2x1024xf32>
    %cst_1 = arith.constant 5.000000e-01 : f32
    %3 = vector.broadcast %cst_1 : f32 to vector<2x1024xf32>
    %4 = arith.minimumf %2, %3 : vector<2x1024xf32>
    %c0_2 = arith.constant 0 : index
    %c0_3 = arith.constant 0 : index
    %5 = vector.load %arg2[%c0_2, %c0_3] : memref<2x1024xf32, #tpu.memory_space<vmem>>, vector<2x1024xf32>
    tpu.vector_store %arg2[%c0_2, %c0_3], %4 {strides = array<i32>} : memref<2x1024xf32, #tpu.memory_space<vmem>>, vector<2x1024xf32>,
    return
  }
  func.func @transform_0(%arg0: i32) -> (i32, i32) {
    %c0_i32 = arith.constant 0 : i32
    %c0_i32_0 = arith.constant 0 : i32
    return %arg0, %c0_i32 : i32, i32
  }
  func.func @transform_1(%arg0: i32) -> (i32, i32) {
    %c0_i32 = arith.constant 0 : i32
    %c0_i32_0 = arith.constant 0 : i32
    return %arg0, %c0_i32 : i32, i32
  }
}

</mosaic_0001>

<bundles_post_ra>
// kernel: tpu_custom_call.1
= control target key start
LH: loop header
LB: loop body
LE: loop exit
PB: predicated region body
PF: predicated region fallthrough
CT: control target
= control target key end

     0   :  { %6 = vsyncpa [#allocation3], 0  ;;  %s132_s0 = inlined_call_operand.hbm [shape: f32[2,1024], index: 0, kind: input, shape index: {}]   ;;  %s133_s1 = inlined_call_operand.hbm [shape: f32[2,1024], index: 1, kind: output, shape index: {}]  }
   0x1   :  { %7 = vsyncpa [#allocation4], 0  ;;  %s96_s6 = smov [#allocation2]   ;;  %s48_s10 = scalar_lea.hbm %s132_s0, 256 }
   0x2   :  { %s14_s7 = sshll.u32 %s96_s6, 4  ;;  %p49_p0 = scmp.ne.s32.totalorder %s132_s0, %s48_s10  ;;  %s15_s7 = int_to_ptr.vmem [resolvable:$true] %s14_s7 }
   0x3   :  { %p52_p1 = scmp.lt.u32.totalorder %s48_s10, %s132_s0 }
   0x5   :  { %p54_p2 = pnand %p52_p1, %p49_p0 }
   0x7   :  { %57 = shalt.err (!%p54_p2)
}
   0x8   :  { %s58_s15 = scalar_lea.vmem %s15_s7, 256  ;;  %p63_p4 = scmp.lt.s32.totalorder %s15_s7, %s15_s7 }
   0x9   :  { %p59_p3 = scmp.ne.s32.totalorder %s15_s7, %s58_s15  ;;  %p64_p5 = scmp.lt.s32.totalorder %s58_s15, %s58_s15 }
   0xb   :  { %p65_p6 = por %p64_p5, %p63_p4 }
   0xd   :  { %p66_p7 = pnand %p65_p6, %p59_p3 }
   0xf   :  { %69 = shalt.err (!%p66_p7)
}
  0x10   :  { %17 = dma.hbm_to_vmem [thread:$0]  %s132_s0, 256, %s15_s7, [#allocation3]  }
  0x11   :  { %92 = dma.done.wait [#allocation3], 256  }
  0x12   :  { %93 = vsyncadd [#allocation3], 4294967040  ;;  %s97_s18 = smov [#allocation5]   ;;  %v21_v0 = vld [vmem:[#allocation2] sm:$0xff]  ;;  %v22_v1 = vld [vmem:[#allocation2 + $0x8] sm:$0xff] }
  0x13   :  { %s35_s19 = sshll.u32 %s97_s18, 4  ;;  %v44_v2 = vclamps-f32 %v21_v0, 0.5  ;;  %v45_v3 = vclamps-f32 %v22_v1, 0.5  ;;  %s36_s19 = int_to_ptr.vmem [resolvable:$true] %s35_s19 }
  0x14   :  { %s70_s20 = scalar_lea.vmem %s36_s19, 256  ;;  %p75_p9 = scmp.lt.s32.totalorder %s36_s19, %s36_s19 }
  0x15   :  { %27 = vst [vmem:[#allocation5] sm:$0xff] %v44_v2  ;;  %28 = vst [vmem:[#allocation5 + $0x8] sm:$0xff] %v45_v3  ;;  %p71_p8 = scmp.ne.s32.totalorder %s36_s19, %s70_s20  ;;  %p76_p10 = scmp.lt.s32.totalorder %s70_s20, %s70_s20 }
  0x17   :  { %p77_p11 = por %p76_p10, %p75_p9 }
  0x19   :  { %p78_p12 = pnand %p77_p11, %p71_p8 }
  0x1b   :  { %81 = shalt.err (!%p78_p12)
}
  0x1c   :  { %s82_s22 = scalar_lea.hbm %s133_s1, 256 }
  0x1d   :  { %p83_p13 = scmp.ne.s32.totalorder %s133_s1, %s82_s22  ;;  %p86_p0 = scmp.lt.u32.totalorder %s82_s22, %s133_s1 }
  0x1f   :  { %p88_p1 = pnand %p86_p0, %p83_p13 }
  0x21   :  { %91 = shalt.err (!%p88_p1)
}
  0x22   :  { %38 = dma.vmem_to_hbm [thread:$0]  %s36_s19, 256, %s133_s1, [#allocation4]  }
  0x23   :  { %94 = dma.done.wait [#allocation4], 256  }
  0x24   :  { %95 = vsyncadd [#allocation4], 4294967040 }
  0x25   :  { %42 = vsyncpa [#allocation3], 1 }
  0x26   :  { %43 = vsyncpa [#allocation4], 1 }

</bundles_post_ra>
